<compile_context>
chip_gen: v6e
topology: v6e:2x2x1
jax: 0.10.0
libtpu: 0.0.40
codegen_flags: <defaults>
</compile_context>

<pallas_src>
import functools

import jax
import jax.numpy as jnp
from jax.experimental import pallas as pl
from jax.experimental.pallas import tpu as pltpu

BN_EPS = 1e-5


def _round_up(x, m):
    return (x + m - 1) // m * m


# --------------------------------------------------------------------------
# Pass 1: per-N-tile conv matmul + per-tile BN partial sums.
# --------------------------------------------------------------------------
def _conv_stats_kernel(g_ref, w_ref, conv_ref, sum_ref, ssq_ref):
    # [TN, KC_pad] (bf16) @ [KC_pad, CP] (bf16) -> [TN, CP] f32 on the MXU.
    x = jnp.dot(g_ref[...], w_ref[...], preferred_element_type=jnp.float32)
    conv_ref[...] = x

    # One-pass BN statistics: per-tile column sum and sum-of-squares.
    s = jnp.sum(x, axis=0, keepdims=True)          # [1, CP]
    ss = jnp.sum(x * x, axis=0, keepdims=True)     # [1, CP]
    # Replicate across 8 sublanes so the partial-sum block is (8, CP)-shaped.
    sum_ref[...] = jnp.broadcast_to(s, sum_ref.shape)
    ssq_ref[...] = jnp.broadcast_to(ss, ssq_ref.shape)


# --------------------------------------------------------------------------
# Pass 2: per-N-tile BN affine + ReLU (kept in f32, lane-dense stores).
# --------------------------------------------------------------------------
def _bn_relu_kernel(conv_ref, scale_ref, shift_ref, out_ref):
    y = conv_ref[...] * scale_ref[...] + shift_ref[...]
    out_ref[...] = jnp.maximum(y, 0.0).astype(out_ref.dtype)


# --------------------------------------------------------------------------
# Glue: build the transposed-conv kernel map and pre-gather features, folding
# the K offsets into the channel (contraction) dimension: [N, K*Cin].
# Points are assumed ordered (b, x, y, z)-major over a dense grid so the
# coordinate -> row lookup is a flat index computation.
# --------------------------------------------------------------------------
def _build_gathered_folded(feats, coords, grid_size, ks):
    N, Cin = feats.shape
    D = grid_size
    half = ks // 2
    offs = jnp.array(
        [(dx, dy, dz)
         for dx in range(-half, half + 1)
         for dy in range(-half, half + 1)
         for dz in range(-half, half + 1)],
        dtype=jnp.int32,
    )                                                       # [K, 3]
    K = offs.shape[0]

    b = coords[:, 0]                                        # [N]
    xyz = coords[:, 1:]                                     # [N, 3]
    nbr = xyz[:, None, :] - offs[None, :, :]                # [N, K, 3] adjoint map
    inb = jnp.all((nbr >= 0) & (nbr < D), axis=-1)          # [N, K]
    flat = ((b[:, None] * D + nbr[..., 0]) * D + nbr[..., 1]) * D + nbr[..., 2]
    flat = jnp.where(inb, flat, 0)
    g = jnp.take(feats, flat.reshape(-1), axis=0).reshape(N, K, Cin)
    g = jnp.where(inb[..., None], g, jnp.zeros((), feats.dtype))
    return g.reshape(N, K * Cin)                            # [N, K*Cin]


@functools.partial(
    jax.jit, static_argnames=("grid_size", "ks", "tile_n", "vmem_limit_bytes")
)
def basic_deconvolution_block(feats, coords, weight, gamma, beta, *,
                              grid_size, ks=3, tile_n=256,
                              vmem_limit_bytes=None):
    """feats [N, Cin], coords [N, 4], weight [K, Cin, Cout], gamma/beta [Cout]."""
    N, Cin = feats.shape
    K, _, Cout = weight.shape
    assert K == ks ** 3

    KC = K * Cin
    KC_pad = _round_up(KC, 128)         # contraction dim, MXU / lane aligned
    CP = _round_up(Cout, 128)           # lane-dense output channels

    TN = _round_up(min(tile_n, _round_up(N, 8)), 8)
    N_pad = _round_up(N, TN)
    num_tiles = N_pad // TN

    # Gather + fold K into the contraction dim; bf16 MXU operands.
    g = _build_gathered_folded(feats, coords, grid_size, ks).astype(jnp.bfloat16)
    g_pad = jnp.zeros((N_pad, KC_pad), jnp.bfloat16).at[:N, :KC].set(g)

    w_flat = weight.reshape(KC, Cout).astype(jnp.bfloat16)
    w_pad = jnp.zeros((KC_pad, CP), jnp.bfloat16).at[:KC, :Cout].set(w_flat)

    cparams = pltpu.CompilerParams(
        dimension_semantics=("parallel",),
        vmem_limit_bytes=vmem_limit_bytes,
    )

    conv, psum, pssq = pl.pallas_call(
        _conv_stats_kernel,
        grid=(num_tiles,),
        in_specs=[
            pl.BlockSpec((TN, KC_pad), lambda i: (i, 0)),
            pl.BlockSpec((KC_pad, CP), lambda i: (0, 0)),
        ],
        out_specs=[
            pl.BlockSpec((TN, CP), lambda i: (i, 0)),
            pl.BlockSpec((8, CP), lambda i: (i, 0)),
            pl.BlockSpec((8, CP), lambda i: (i, 0)),
        ],
        out_shape=[
            jax.ShapeDtypeStruct((N_pad, CP), jnp.float32),
            jax.ShapeDtypeStruct((num_tiles * 8, CP), jnp.float32),
            jax.ShapeDtypeStruct((num_tiles * 8, CP), jnp.float32),
        ],
        compiler_params=cparams,
    )(g_pad, w_pad)

    # Tiny cross-tile reduce for BatchNorm statistics (training-mode, biased
    # variance over the real N points; padded rows contribute exact zeros).
    tsum = psum.reshape(num_tiles, 8, CP)[:, 0, :].sum(axis=0)      # [CP]
    tssq = pssq.reshape(num_tiles, 8, CP)[:, 0, :].sum(axis=0)      # [CP]
    mean = tsum / N
    var = jnp.maximum(tssq / N - mean * mean, 0.0)
    inv = jax.lax.rsqrt(var + BN_EPS)

    gamma_pad = jnp.zeros((CP,), jnp.float32).at[:Cout].set(gamma.astype(jnp.float32))
    beta_pad = jnp.zeros((CP,), jnp.float32).at[:Cout].set(beta.astype(jnp.float32))
    scale = (gamma_pad * inv).reshape(1, CP)
    shift = (beta_pad - mean * gamma_pad * inv).reshape(1, CP)

    out = pl.pallas_call(
        _bn_relu_kernel,
        grid=(num_tiles,),
        in_specs=[
            pl.BlockSpec((TN, CP), lambda i: (i, 0)),
            pl.BlockSpec((1, CP), lambda i: (0, 0)),
            pl.BlockSpec((1, CP), lambda i: (0, 0)),
        ],
        out_specs=pl.BlockSpec((TN, CP), lambda i: (i, 0)),
        out_shape=jax.ShapeDtypeStruct((N_pad, CP), jnp.float32),
        compiler_params=cparams,
    )(conv, scale, shift)

    return out[:N, :Cout]


def _reference(feats, coords, weight, gamma, beta, *, grid_size, ks=3):
    """Pure-JAX reference (same bf16 operand rounding as the kernel path)."""
    g = _build_gathered_folded(feats, coords, grid_size, ks)         # [N, K*Cin]
    gb = g.astype(jnp.bfloat16)
    wb = weight.reshape(-1, weight.shape[-1]).astype(jnp.bfloat16)
    conv = jnp.dot(gb, wb, preferred_element_type=jnp.float32)       # [N, Cout]
    mean = jnp.mean(conv, axis=0, keepdims=True)
    var = jnp.mean((conv - mean) ** 2, axis=0, keepdims=True)
    y = (conv - mean) * jax.lax.rsqrt(var + BN_EPS) * gamma[None, :] + beta[None, :]
    return jnp.maximum(y, 0.0)


if __name__ == "__main__":
    # Small synthetic shapes: batch=2 sparse batches on a dense 8^3 grid
    # (N = 2*8^3 = 1024 active voxels), inc=8, outc=16, ks=3, stride=1.
    B, D, Cin, Cout, ks = 2, 8, 8, 16, 3
    N = B * D * D * D

    key = jax.random.PRNGKey(0)
    k_feat, k_w = jax.random.split(key)

    feats = jax.random.normal(k_feat, (N, Cin), dtype=jnp.float32)

    # Dense occupancy coordinates, (b, x, y, z)-major ordering.
    b_idx, x_idx, y_idx, z_idx = jnp.meshgrid(
        jnp.arange(B, dtype=jnp.int32),
        jnp.arange(D, dtype=jnp.int32),
        jnp.arange(D, dtype=jnp.int32),
        jnp.arange(D, dtype=jnp.int32),
        indexing="ij",
    )
    coords = jnp.stack(
        [b_idx.ravel(), x_idx.ravel(), y_idx.ravel(), z_idx.ravel()], axis=1
    )                                                              # [N, 4]

    # Deterministic parameter init (spnn.Conv3d transposed has no bias).
    weight = (jax.random.normal(k_w, (ks ** 3, Cin, Cout), dtype=jnp.float32)
              * (1.0 / jnp.sqrt(Cin * ks ** 3)))
    gamma = jnp.linspace(0.5, 1.5, Cout, dtype=jnp.float32)
    beta = jnp.linspace(-0.2, 0.2, Cout, dtype=jnp.float32)

    out = basic_deconvolution_block(
        feats, coords, weight, gamma, beta, grid_size=D, ks=ks, tile_n=256
    )
    out = jax.block_until_ready(out)

    ref = _reference(feats, coords, weight, gamma, beta, grid_size=D, ks=ks)
    assert out.shape == (N, Cout)
    assert jnp.allclose(out, ref, atol=2e-3, rtol=2e-3)

    print("KERNEL_OK")
</pallas_src>

<mosaic_0001>
module attributes {stable_mosaic.version = 11 : i64} {
  func.func @_conv_stats_kernel(%arg0: i32, %arg1: memref<256x256xbf16, #tpu.memory_space<vmem>>, %arg2: memref<256x128xbf16, #tpu.memory_space<vmem>>, %arg3: memref<256x128xf32, #tpu.memory_space<vmem>>, %arg4: memref<8x128xf32, #tpu.memory_space<vmem>>, %arg5: memref<8x128xf32, #tpu.memory_space<vmem>>) attributes {dimension_semantics = [#tpu.dimension_semantics<parallel>], iteration_bounds = array<i64: 4>, scalar_prefetch = 0 : i64, scratch_operands = 0 : i64, tpu.core_type = #tpu.core_type<tc>, window_params = [{transform_indices = @transform_0, window_bounds = array<i64: 256, 256>}, {pipeline_mode = #tpu.pipeline_mode<synchronous>, transform_indices = @transform_1, window_bounds = array<i64: 256, 128>}, {transform_indices = @transform_2, window_bounds = array<i64: 256, 128>}, {transform_indices = @transform_3, window_bounds = array<i64: 8, 128>}, {transform_indices = @transform_4, window_bounds = array<i64: 8, 128>}]} {
    %c0 = arith.constant 0 : index
    %c0_0 = arith.constant 0 : index
    %0 = vector.load %arg1[%c0, %c0_0] : memref<256x256xbf16, #tpu.memory_space<vmem>>, vector<256x256xbf16>
    %c0_1 = arith.constant 0 : index
    %c0_2 = arith.constant 0 : index
    %1 = vector.load %arg2[%c0_1, %c0_2] : memref<256x128xbf16, #tpu.memory_space<vmem>>, vector<256x128xbf16>
    %cst = arith.constant dense<0.000000e+00> : vector<256x128xf32>
    %2 = tpu.matmul %0, %1, %cst {dimension_numbers = #tpu.dot_dimension_numbers<[1], [0], [0], [1], [0, 0, 1, 1], [], []>} : vector<256x256xbf16>, vector<256x128xbf16>, vector<256x128xf32> -> vector<256x128xf32>
    %c0_3 = arith.constant 0 : index
    %c0_4 = arith.constant 0 : index
    %3 = vector.load %arg3[%c0_3, %c0_4] : memref<256x128xf32, #tpu.memory_space<vmem>>, vector<256x128xf32>
    tpu.vector_store %arg3[%c0_3, %c0_4], %2 {strides = array<i32>} : memref<256x128xf32, #tpu.memory_space<vmem>>, vector<256x128xf32>,
    %cst_5 = arith.constant dense<0.000000e+00> : vector<128xf32>
    %4 = vector.multi_reduction <add>, %2, %cst_5 [0] : vector<256x128xf32> to vector<128xf32>
    %5 = vector.shape_cast %4 : vector<128xf32> to vector<1x128xf32>
    %6 = arith.mulf %2, %2 : vector<256x128xf32>
    %cst_6 = arith.constant dense<0.000000e+00> : vector<128xf32>
    %7 = vector.multi_reduction <add>, %6, %cst_6 [0] : vector<256x128xf32> to vector<128xf32>
    %8 = vector.shape_cast %7 : vector<128xf32> to vector<1x128xf32>
    %9 = vector.shape_cast %5 : vector<1x128xf32> to vector<1x128xf32>
    %10 = vector.broadcast %9 : vector<1x128xf32> to vector<8x128xf32>
    %c0_7 = arith.constant 0 : index
    %c0_8 = arith.constant 0 : index
    %11 = vector.load %arg4[%c0_7, %c0_8] : memref<8x128xf32, #tpu.memory_space<vmem>>, vector<8x128xf32>
    tpu.vector_store %arg4[%c0_7, %c0_8], %10 {strides = array<i32>} : memref<8x128xf32, #tpu.memory_space<vmem>>, vector<8x128xf32>,
    %12 = vector.shape_cast %8 : vector<1x128xf32> to vector<1x128xf32>
    %13 = vector.broadcast %12 : vector<1x128xf32> to vector<8x128xf32>
    %c0_9 = arith.constant 0 : index
    %c0_10 = arith.constant 0 : index
    %14 = vector.load %arg5[%c0_9, %c0_10] : memref<8x128xf32, #tpu.memory_space<vmem>>, vector<8x128xf32>
    tpu.vector_store %arg5[%c0_9, %c0_10], %13 {strides = array<i32>} : memref<8x128xf32, #tpu.memory_space<vmem>>, vector<8x128xf32>,
    return
  }
  func.func @transform_0(%arg0: i32) -> (i32, i32) {
    %c0_i32 = arith.constant 0 : i32
    %c0_i32_0 = arith.constant 0 : i32
    return %arg0, %c0_i32 : i32, i32
  }
  func.func @transform_1(%arg0: i32) -> (i32, i32) {
    %c0_i32 = arith.constant 0 : i32
    %c0_i32_0 = arith.constant 0 : i32
    %c0_i32_1 = arith.constant 0 : i32
    return %c0_i32, %c0_i32_0 : i32, i32
  }
  func.func @transform_2(%arg0: i32) -> (i32, i32) {
    %c0_i32 = arith.constant 0 : i32
    %c0_i32_0 = arith.constant 0 : i32
    return %arg0, %c0_i32 : i32, i32
  }
  func.func @transform_3(%arg0: i32) -> (i32, i32) {
    %c0_i32 = arith.constant 0 : i32
    %c0_i32_0 = arith.constant 0 : i32
    return %arg0, %c0_i32 : i32, i32
  }
  func.func @transform_4(%arg0: i32) -> (i32, i32) {
    %c0_i32 = arith.constant 0 : i32
    %c0_i32_0 = arith.constant 0 : i32
    return %arg0, %c0_i32 : i32, i32
  }
}

module attributes {stable_mosaic.version = 11 : i64} {
  func.func @_bn_relu_kernel(%arg0: i32, %arg1: memref<256x128xf32, #tpu.memory_space<vmem>>, %arg2: memref<1x128xf32, #tpu.memory_space<vmem>>, %arg3: memref<1x128xf32, #tpu.memory_space<vmem>>, %arg4: memref<256x128xf32, #tpu.memory_space<vmem>>) attributes {dimension_semantics = [#tpu.dimension_semantics<parallel>], iteration_bounds = array<i64: 4>, scalar_prefetch = 0 : i64, scratch_operands = 0 : i64, tpu.core_type = #tpu.core_type<tc>, window_params = [{transform_indices = @transform_0, window_bounds = array<i64: 256, 128>}, {pipeline_mode = #tpu.pipeline_mode<synchronous>, transform_indices = @transform_1, window_bounds = array<i64: 1, 128>}, {pipeline_mode = #tpu.pipeline_mode<synchronous>, transform_indices = @transform_2, window_bounds = array<i64: 1, 128>}, {transform_indices = @transform_3, window_bounds = array<i64: 256, 128>}]} {
    %c0 = arith.constant 0 : index
    %c0_0 = arith.constant 0 : index
    %0 = vector.load %arg1[%c0, %c0_0] : memref<256x128xf32, #tpu.memory_space<vmem>>, vector<256x128xf32>
    %c0_1 = arith.constant 0 : index
    %c0_2 = arith.constant 0 : index
    %1 = vector.load %arg2[%c0_1, %c0_2] : memref<1x128xf32, #tpu.memory_space<vmem>>, vector<1x128xf32>
    %2 = vector.broadcast %1 : vector<1x128xf32> to vector<256x128xf32>
    %3 = arith.mulf %0, %2 : vector<256x128xf32>
    %c0_3 = arith.constant 0 : index
    %c0_4 = arith.constant 0 : index
    %4 = vector.load %arg3[%c0_3, %c0_4] : memref<1x128xf32, #tpu.memory_space<vmem>>, vector<1x128xf32>
    %5 = vector.broadcast %4 : vector<1x128xf32> to vector<256x128xf32>
    %6 = arith.addf %3, %5 : vector<256x128xf32>
    %cst = arith.constant 0.000000e+00 : f32
    %7 = vector.broadcast %cst : f32 to vector<256x128xf32>
    %8 = arith.maximumf %6, %7 : vector<256x128xf32>
    %c0_5 = arith.constant 0 : index
    %c0_6 = arith.constant 0 : index
    %9 = vector.load %arg4[%c0_5, %c0_6] : memref<256x128xf32, #tpu.memory_space<vmem>>, vector<256x128xf32>
    tpu.vector_store %arg4[%c0_5, %c0_6], %8 {strides = array<i32>} : memref<256x128xf32, #tpu.memory_space<vmem>>, vector<256x128xf32>,
    return
  }
  func.func @transform_0(%arg0: i32) -> (i32, i32) {
    %c0_i32 = arith.constant 0 : i32
    %c0_i32_0 = arith.constant 0 : i32
    return %arg0, %c0_i32 : i32, i32
  }
  func.func @transform_1(%arg0: i32) -> (i32, i32) {
    %c0_i32 = arith.constant 0 : i32
    %c0_i32_0 = arith.constant 0 : i32
    %c0_i32_1 = arith.constant 0 : i32
    return %c0_i32, %c0_i32_0 : i32, i32
  }
  func.func @transform_2(%arg0: i32) -> (i32, i32) {
    %c0_i32 = arith.constant 0 : i32
    %c0_i32_0 = arith.constant 0 : i32
    %c0_i32_1 = arith.constant 0 : i32
    return %c0_i32, %c0_i32_0 : i32, i32
  }
  func.func @transform_3(%arg0: i32) -> (i32, i32) {
    %c0_i32 = arith.constant 0 : i32
    %c0_i32_0 = arith.constant 0 : i32
    return %arg0, %c0_i32 : i32, i32
  }
}

</mosaic_0001>

<bundles_post_ra>
// kernel: basic_deconvolution_block.3
= control target key start
LH: loop header
LB: loop body
LE: loop exit
PB: predicated region body
PF: predicated region fallthrough
CT: control target
= control target key end

     0   :  { %s453_s12 = smov 0   ;;  %s612_s0 = inlined_call_operand.vmem [shape: f32[1024,128], index: 0, kind: input, shape index: {}]   ;;  %s613_s1 = inlined_call_operand.vmem [shape: f32[1,128], index: 1, kind: input, shape index: {}]   ;;  %s614_s2 = inlined_call_operand.vmem [shape: f32[1,128], index: 2, kind: input, shape index: {}]   ;;  %s615_s3 = inlined_call_operand.vmem [shape: f32[1024,128], index: 3, kind: output, shape index: {}]  }
   0x1 LB: > { %s404_s13 = sadd.s32 4294967295, %s431_s12   ;;  %p408_p0 = scmp.ge.s32.totalorder %s431_s12, 1  ;;  %s431_s12 = sphi %s453_s12, %s13_s12  }
   0x2   : > { %p138_p1 = scmp.lt.s32.totalorder %s431_s12, 5 }
   0x4   : > { %p139_p2 = pnand %p408_p0, %p138_p1 }
   0x5   : > { %s409_s14 = sshll.u32 (!%p139_p2), %s404_s13, 5 }
   0x6   : > { %142 = sbr.rel (%p139_p2) target bundleno = 44 (0x2c), region = 32  ;;  %p163_p3 = scmp.lt.s32.totalorder (!%p139_p2), %s409_s14, 127 }
   0xb   : > { %s617_s14 = smov (!%p163_p3, %s409_s14), 127  ;;  %v464_v0 = vld [vmem:[%s613_s1] ss:$0 sm:$0xff] }
   0xc   : > { %s410_s15 = sshll.u32 %s617_s14, 3  ;;  %v474_v1 = vld [vmem:[%s614_s2] ss:$0 sm:$0xff] }
   0xd   : > { %s469_s20 = scalar_lea.vmem %s612_s0, %s410_s15  ;;  %s497_s25 = scalar_lea.vmem %s615_s3, %s410_s15 }
   0xe   : > { %v174_v2 = vld [vmem:[%s469_s20] sm:$0xff]  ;;  %v175_v3 = vld [vmem:[%s469_s20 + $0x8] sm:$0xff]  ;;  %v176_v4 = vld [vmem:[%s469_s20 + $0x10] sm:$0xff] }
   0xf   : > { %v213_v5 = vmul.f32 %v464_v0, %v174_v2  ;;  %v214_v6 = vmul.f32 %v464_v0, %v175_v3  ;;  %v215_v7 = vmul.f32 %v464_v0, %v176_v4  ;;  %v177_v8 = vld [vmem:[%s469_s20 + $0x18] sm:$0xff]  ;;  %v178_v9 = vld [vmem:[%s469_s20 + $0x20] sm:$0xff]  ;;  %v179_v10 = vld [vmem:[%s469_s20 + $0x28] sm:$0xff] }
  0x10   : > { %v216_v11 = vmul.f32 %v464_v0, %v177_v8  ;;  %v217_v12 = vmul.f32 %v464_v0, %v178_v9  ;;  %v218_v13 = vmul.f32 %v464_v0, %v179_v10  ;;  %v180_v14 = vld [vmem:[%s469_s20 + $0x30] sm:$0xff]  ;;  %v181_v15 = vld [vmem:[%s469_s20 + $0x38] sm:$0xff]  ;;  %v182_v24 = vld [vmem:[%s469_s20 + $0x40] sm:$0xff] }
  0x11   : > { %v252_v16 = vadd.f32 %v474_v1, %v213_v5  ;;  %v253_v17 = vadd.f32 %v474_v1, %v214_v6  ;;  %v254_v18 = vadd.f32 %v474_v1, %v215_v7  ;;  %v219_v19 = vmul.f32 %v464_v0, %v180_v14  ;;  %v183_v25 = vld [vmem:[%s469_s20 + $0x48] sm:$0xff]  ;;  %v184_v26 = vld [vmem:[%s469_s20 + $0x50] sm:$0xff]  ;;  %v185_v31 = vld [vmem:[%s469_s20 + $0x58] sm:$0xff] }
  0x12   : > { %v255_v20 = vadd.f32 %v474_v1, %v216_v11  ;;  %v256_v21 = vadd.f32 %v474_v1, %v217_v12  ;;  %v257_v22 = vadd.f32 %v474_v1, %v218_v13  ;;  %v220_v23 = vmul.f32 %v464_v0, %v181_v15  ;;  %v186_v32 = vld [vmem:[%s469_s20 + $0x60] sm:$0xff]  ;;  %v187_v33 = vld [vmem:[%s469_s20 + $0x68] sm:$0xff]  ;;  %v188_v38 = vld [vmem:[%s469_s20 + $0x70] sm:$0xff] }
  0x13   : > { %v284_v27 = vmax.f32 %v252_v16, 0.0  ;;  %v285_v28 = vmax.f32 %v253_v17, 0.0  ;;  %v286_v29 = vmax.f32 %v254_v18, 0.0  ;;  %v258_v30 = vadd.f32 %v474_v1, %v219_v19  ;;  %v189_v43 = vld [vmem:[%s469_s20 + $0x78] sm:$0xff]  ;;  %v190_v56 = vld [vmem:[%s469_s20 + $0x80] sm:$0xff]  ;;  %v191_v57 = vld [vmem:[%s469_s20 + $0x88] sm:$0xff] }
  0x14   : > { %v287_v34 = vmax.f32 %v255_v20, 0.0  ;;  %v288_v35 = vmax.f32 %v256_v21, 0.0  ;;  %v289_v36 = vmax.f32 %v257_v22, 0.0  ;;  %v259_v37 = vadd.f32 %v474_v1, %v220_v23  ;;  %v192_v58 = vld [vmem:[%s469_s20 + $0x90] sm:$0xff]  ;;  %v193_v63 = vld [vmem:[%s469_s20 + $0x98] sm:$0xff]  ;;  %v194_v2 = vld [vmem:[%s469_s20 + $0xa0] sm:$0xff] }
  0x15   : > { %316 = vst [vmem:[%s497_s25] sm:$0xff] %v284_v27  ;;  %317 = vst [vmem:[%s497_s25 + $0x8] sm:$0xff] %v285_v28  ;;  %v290_v39 = vmax.f32 %v258_v30, 0.0  ;;  %v221_v40 = vmul.f32 %v464_v0, %v182_v24  ;;  %v222_v41 = vmul.f32 %v464_v0, %v183_v25  ;;  %v223_v42 = vmul.f32 %v464_v0, %v184_v26  ;;  %v195_v3 = vld [vmem:[%s469_s20 + $0xa8] sm:$0xff]  ;;  %v196_v8 = vld [vmem:[%s469_s20 + $0xb0] sm:$0xff] }
  0x16   : > { %318 = vst [vmem:[%s497_s25 + $0x10] sm:$0xff] %v286_v29  ;;  %319 = vst [vmem:[%s497_s25 + $0x18] sm:$0xff] %v287_v34  ;;  %v291_v44 = vmax.f32 %v259_v37, 0.0  ;;  %v224_v45 = vmul.f32 %v464_v0, %v185_v31  ;;  %v225_v46 = vmul.f32 %v464_v0, %v186_v32  ;;  %v226_v47 = vmul.f32 %v464_v0, %v187_v33  ;;  %v197_v13 = vld [vmem:[%s469_s20 + $0xb8] sm:$0xff]  ;;  %v198_v26 = vld [vmem:[%s469_s20 + $0xc0] sm:$0xff] }
  0x17   : > { %320 = vst [vmem:[%s497_s25 + $0x20] sm:$0xff] %v288_v35  ;;  %321 = vst [vmem:[%s497_s25 + $0x28] sm:$0xff] %v289_v36  ;;  %v260_v48 = vadd.f32 %v474_v1, %v221_v40  ;;  %v261_v49 = vadd.f32 %v474_v1, %v222_v41  ;;  %v262_v50 = vadd.f32 %v474_v1, %v223_v42  ;;  %v199_v27 = vld [vmem:[%s469_s20 + $0xc8] sm:$0xff]  ;;  %v200_v28 = vld [vmem:[%s469_s20 + $0xd0] sm:$0xff] }
  0x18   : > { %322 = vst [vmem:[%s497_s25 + $0x30] sm:$0xff] %v290_v39  ;;  %v227_v51 = vmul.f32 %v464_v0, %v188_v38  ;;  %323 = vst [vmem:[%s497_s25 + $0x38] sm:$0xff] %v291_v44  ;;  %v263_v52 = vadd.f32 %v474_v1, %v224_v45  ;;  %v264_v53 = vadd.f32 %v474_v1, %v225_v46  ;;  %v201_v33 = vld [vmem:[%s469_s20 + $0xd8] sm:$0xff]  ;;  %v202_v34 = vld [vmem:[%s469_s20 + $0xe0] sm:$0xff] }
  0x19   : > { %v265_v54 = vadd.f32 %v474_v1, %v226_v47  ;;  %v228_v55 = vmul.f32 %v464_v0, %v189_v43  ;;  %v292_v59 = vmax.f32 %v260_v48, 0.0  ;;  %v293_v60 = vmax.f32 %v261_v49, 0.0  ;;  %v203_v35 = vld [vmem:[%s469_s20 + $0xe8] sm:$0xff]  ;;  %v204_v40 = vld [vmem:[%s469_s20 + $0xf0] sm:$0xff]  ;;  %v205_v45 = vld [vmem:[%s469_s20 + $0xf8] sm:$0xff] }
  0x1a   : > { %v294_v61 = vmax.f32 %v262_v50, 0.0  ;;  %v266_v62 = vadd.f32 %v474_v1, %v227_v51  ;;  %v295_v4 = vmax.f32 %v263_v52, 0.0  ;;  %v296_v5 = vmax.f32 %v264_v53, 0.0 }
  0x1b   : > { %v297_v6 = vmax.f32 %v265_v54, 0.0  ;;  %v267_v7 = vadd.f32 %v474_v1, %v228_v55  ;;  %324 = vst [vmem:[%s497_s25 + $0x40] sm:$0xff] %v292_v59  ;;  %325 = vst [vmem:[%s497_s25 + $0x48] sm:$0xff] %v293_v60  ;;  %v229_v10 = vmul.f32 %v464_v0, %v190_v56  ;;  %v230_v11 = vmul.f32 %v464_v0, %v191_v57 }
  0x1c   : > { %326 = vst [vmem:[%s497_s25 + $0x50] sm:$0xff] %v294_v61  ;;  %v298_v9 = vmax.f32 %v266_v62, 0.0  ;;  %v231_v12 = vmul.f32 %v464_v0, %v192_v58  ;;  %327 = vst [vmem:[%s497_s25 + $0x58] sm:$0xff] %v295_v4  ;;  %v232_v15 = vmul.f32 %v464_v0, %v193_v63  ;;  %v233_v16 = vmul.f32 %v464_v0, %v194_v2 }
  0x1d   : > { %328 = vst [vmem:[%s497_s25 + $0x60] sm:$0xff] %v296_v5  ;;  %329 = vst [vmem:[%s497_s25 + $0x68] sm:$0xff] %v297_v6  ;;  %v299_v14 = vmax.f32 %v267_v7, 0.0  ;;  %v234_v17 = vmul.f32 %v464_v0, %v195_v3  ;;  %v268_v18 = vadd.f32 %v474_v1, %v229_v10  ;;  %v269_v19 = vadd.f32 %v474_v1, %v230_v11 }
  0x1e   : > { %330 = vst [vmem:[%s497_s25 + $0x70] sm:$0xff] %v298_v9  ;;  %v270_v20 = vadd.f32 %v474_v1, %v231_v12  ;;  %v235_v21 = vmul.f32 %v464_v0, %v196_v8  ;;  %v271_v22 = vadd.f32 %v474_v1, %v232_v15  ;;  %v272_v23 = vadd.f32 %v474_v1, %v233_v16 }
  0x1f   : > { %331 = vst [vmem:[%s497_s25 + $0x78] sm:$0xff] %v299_v14  ;;  %v273_v24 = vadd.f32 %v474_v1, %v234_v17  ;;  %v236_v25 = vmul.f32 %v464_v0, %v197_v13  ;;  %v300_v29 = vmax.f32 %v268_v18, 0.0  ;;  %v301_v30 = vmax.f32 %v269_v19, 0.0 }
  0x20   : > { %v302_v31 = vmax.f32 %v270_v20, 0.0  ;;  %v274_v32 = vadd.f32 %v474_v1, %v235_v21  ;;  %v303_v36 = vmax.f32 %v271_v22, 0.0  ;;  %v304_v37 = vmax.f32 %v272_v23, 0.0 }
  0x21   : > { %v305_v38 = vmax.f32 %v273_v24, 0.0  ;;  %v275_v39 = vadd.f32 %v474_v1, %v236_v25  ;;  %332 = vst [vmem:[%s497_s25 + $0x80] sm:$0xff] %v300_v29  ;;  %333 = vst [vmem:[%s497_s25 + $0x88] sm:$0xff] %v301_v30  ;;  %v237_v42 = vmul.f32 %v464_v0, %v198_v26  ;;  %v238_v43 = vmul.f32 %v464_v0, %v199_v27 }
  0x22   : > { %334 = vst [vmem:[%s497_s25 + $0x90] sm:$0xff] %v302_v31  ;;  %v306_v41 = vmax.f32 %v274_v32, 0.0  ;;  %v239_v44 = vmul.f32 %v464_v0, %v200_v28  ;;  %335 = vst [vmem:[%s497_s25 + $0x98] sm:$0xff] %v303_v36  ;;  %v240_v47 = vmul.f32 %v464_v0, %v201_v33  ;;  %v241_v48 = vmul.f32 %v464_v0, %v202_v34 }
  0x23   : > { %336 = vst [vmem:[%s497_s25 + $0xa0] sm:$0xff] %v304_v37  ;;  %337 = vst [vmem:[%s497_s25 + $0xa8] sm:$0xff] %v305_v38  ;;  %v307_v46 = vmax.f32 %v275_v39, 0.0  ;;  %v242_v49 = vmul.f32 %v464_v0, %v203_v35  ;;  %v276_v50 = vadd.f32 %v474_v1, %v237_v42  ;;  %v277_v51 = vadd.f32 %v474_v1, %v238_v43 }
  0x24   : > { %338 = vst [vmem:[%s497_s25 + $0xb0] sm:$0xff] %v306_v41  ;;  %v278_v52 = vadd.f32 %v474_v1, %v239_v44  ;;  %v243_v53 = vmul.f32 %v464_v0, %v204_v40  ;;  %v279_v54 = vadd.f32 %v474_v1, %v240_v47  ;;  %v280_v55 = vadd.f32 %v474_v1, %v241_v48 }
  0x25   : > { %339 = vst [vmem:[%s497_s25 + $0xb8] sm:$0xff] %v307_v46  ;;  %v281_v56 = vadd.f32 %v474_v1, %v242_v49  ;;  %v244_v57 = vmul.f32 %v464_v0, %v205_v45  ;;  %v308_v58 = vmax.f32 %v276_v50, 0.0  ;;  %v309_v59 = vmax.f32 %v277_v51, 0.0 }
  0x26   : > { %v310_v60 = vmax.f32 %v278_v52, 0.0  ;;  %v282_v61 = vadd.f32 %v474_v1, %v243_v53  ;;  %v311_v62 = vmax.f32 %v279_v54, 0.0  ;;  %v312_v63 = vmax.f32 %v280_v55, 0.0 }
  0x27   : > { %v313_v2 = vmax.f32 %v281_v56, 0.0  ;;  %v283_v3 = vadd.f32 %v474_v1, %v244_v57  ;;  %340 = vst [vmem:[%s497_s25 + $0xc0] sm:$0xff] %v308_v58  ;;  %341 = vst [vmem:[%s497_s25 + $0xc8] sm:$0xff] %v309_v59 }
  0x28   : > { %342 = vst [vmem:[%s497_s25 + $0xd0] sm:$0xff] %v310_v60  ;;  %v314_v4 = vmax.f32 %v282_v61, 0.0  ;;  %343 = vst [vmem:[%s497_s25 + $0xd8] sm:$0xff] %v311_v62 }
  0x29   : > { %344 = vst [vmem:[%s497_s25 + $0xe0] sm:$0xff] %v312_v63  ;;  %345 = vst [vmem:[%s497_s25 + $0xe8] sm:$0xff] %v313_v2  ;;  %v315_v0 = vmax.f32 %v283_v3, 0.0 }
  0x2a   : > { %346 = vst [vmem:[%s497_s25 + $0xf0] sm:$0xff] %v314_v4 }
  0x2b   : > { %347 = vst [vmem:[%s497_s25 + $0xf8] sm:$0xff] %v315_v0 }
  0x2c PF: > { %s13_s12 = sadd.s32 1, %s431_s12  }
  0x2d   : > { %p10_p4 = scmp.ge.s32.totalorder %s13_s12, 6  }
  0x2f   :  { %12 = sbr.rel (!%p10_p4) target bundleno = 1 (0x1), region = 62 }

// kernel: basic_deconvolution_block.2
= control target key start
LH: loop header
LB: loop body
LE: loop exit
PB: predicated region body
PF: predicated region fallthrough
CT: control target
= control target key end

     0   :  { %s1261_s15 = smov 0   ;;  %s1502_s0 = inlined_call_operand.vmem [shape: bf16[1024,256], index: 0, kind: input, shape index: {}]   ;;  %s1503_s1 = inlined_call_operand.vmem [shape: bf16[256,128], index: 1, kind: input, shape index: {}]   ;;  %s1504_s2 = inlined_call_operand.vmem [shape: f32[1024,128], index: 2, kind: output, shape index: {0}]   ;;  %s1505_s3 = inlined_call_operand.vmem [shape: f32[32,128], index: 3, kind: output, shape index: {1}]   ;;  %s1506_s4 = inlined_call_operand.vmem [shape: f32[32,128], index: 4, kind: output, shape index: {2}]  }
   0x1 LB: > { %s1267_s16 = sadd.s32 4294967295, %s1234_s15   ;;  %p969_p0 = scmp.ge.s32.totalorder %s1234_s15, 1  ;;  %s1234_s15 = sphi %s1261_s15, %s15_s15  }
   0x2   : > { %p169_p1 = scmp.lt.s32.totalorder %s1234_s15, 5 }
   0x4   : > { %p170_p2 = pnand %p969_p0, %p169_p1 }
   0x5   : > { %s970_s19 = sshll.u32 (!%p170_p2), %s1267_s16, 5  ;;  %p217_p4 = scmp.lt.s32.totalorder (!%p170_p2), %s1267_s16, 3 }
   0x6   : > { %173 = sbr.rel (%p170_p2) target bundleno = 350 (0x15e), region = 28  ;;  %p205_p3 = scmp.lt.s32.totalorder (!%p170_p2), %s970_s19, 127 }
   0xb   : > { %v1164_v0 = vld [vmem:[%s1503_s1 + $0x78] sm:$0xff]   ;;  %v1166_v2 = vld [vmem:[%s1503_s1 + $0x70] sm:$0xff]   ;;  %v1168_v4 = vld [vmem:[%s1503_s1 + $0x68] sm:$0xff]   ;;  %s1508_s19 = smov (!%p205_p3, %s970_s19), 127  ;;  %s1510_s16 = smov (!%p217_p4, %s1267_s16), 3 }
   0xc   : > { %v1165_v1 = vld [vmem:[%s1503_s1 + $0x38] sm:$0xff]   ;;  %1028 = vmatprep.subr.bf16.mxu0 %v1164_v0  ;;  %1140 = vmatprep.subr.bf16.mxu1 %v1164_v0  ;;  %v1167_v3 = vld [vmem:[%s1503_s1 + $0x30] sm:$0xff]   ;;  %v1169_v5 = vld [vmem:[%s1503_s1 + $0x28] sm:$0xff]   ;;  %s1027_s8 = sshll.u32 %s1508_s19, 3  ;;  %s975_s19 = sshll.u32 %s1510_s16, 3 }
   0xd   : > { %1029 = vmatpush3.bf16.msra.mxu0 %v1165_v1  ;;  %1148 = vmatpush3.bf16.msra.mxu1 %v1165_v1  ;;  %v1170_v6 = vld [vmem:[%s1503_s1 + $0x60] sm:$0xff]   ;;  %v1172_v8 = vld [vmem:[%s1503_s1 + $0x58] sm:$0xff]   ;;  %s1307_s13 = scalar_lea.vmem %s1502_s0, %s1027_s8  ;;  %v1174_v10 = vld [vmem:[%s1503_s1 + $0x50] sm:$0xff]   ;;  %s1367_s7 = scalar_lea.vmem %s1504_s2, %s1027_s8 }
   0xe   : > { %1030 = vmatprep.subr.bf16.mxu0 %v1166_v2  ;;  %1141 = vmatprep.subr.bf16.mxu1 %v1166_v2  ;;  %v1171_v7 = vld [vmem:[%s1503_s1 + $0x20] sm:$0xff]   ;;  %v1173_v9 = vld [vmem:[%s1503_s1 + $0x18] sm:$0xff]   ;;  %v1175_v12 = vld [vmem:[%s1503_s1 + $0x10] sm:$0xff]   ;;  %s220_s10 = scalar_lea.vmem %s1505_s3, %s975_s19 }
   0xf   : > { %v1182_v11 = vld [vmem:[%s1307_s13 + $0x4] ss:$8 sps:$4 sm:$0xff]   ;;  %v1180_v18 = vld [vmem:[%s1307_s13] ss:$8 sps:$4 sm:$0xff]   ;;  %v1183_v19 = vld [vmem:[%s1307_s13 + $0x14] ss:$8 sps:$4 sm:$0xff]  }
  0x10   : > { %578 = vmatprep.mubr.bf16.mxu0 %v1182_v11  ;;  %v1176_v13 = vld [vmem:[%s1503_s1 + $0x48] sm:$0xff]   ;;  %v1178_v16 = vld [vmem:[%s1503_s1 + $0x40] sm:$0xff]   ;;  %v1198_v21 = vld [vmem:[%s1307_s13 + $0x94] ss:$8 sps:$4 sm:$0xff]  }
  0x11   : > { %1031 = vmatpush3.bf16.msra.mxu0 %v1167_v3  ;;  %1149 = vmatpush3.bf16.msra.mxu1 %v1167_v3  ;;  %v1194_v14 = vld [vmem:[%s1307_s13 + $0x84] ss:$8 sps:$4 sm:$0xff]   ;;  %v1192_v20 = vld [vmem:[%s1307_s13 + $0x80] ss:$8 sps:$4 sm:$0xff]   ;;  %v1185_v22 = vld [vmem:[%s1307_s13 + $0x10] ss:$8 sps:$4 sm:$0xff]  }
  0x12   : > { %1032 = vmatprep.subr.bf16.mxu0 %v1168_v4  ;;  %1142 = vmatprep.subr.bf16.mxu1 %v1168_v4  ;;  %v1177_v15 = vld [vmem:[%s1503_s1 + $0x8] sm:$0xff]   ;;  %v1179_v17 = vld [vmem:[%s1503_s1] sm:$0xff]   ;;  %v1200_v24 = vld [vmem:[%s1307_s13 + $0x90] ss:$8 sps:$4 sm:$0xff]  }
  0x13   : > { %642 = vmatprep.mubr.bf16.mxu1 %v1194_v14  ;;  %v1186_v23 = vld [vmem:[%s1307_s13 + $0x24] ss:$8 sps:$4 sm:$0xff]   ;;  %v1188_v26 = vld [vmem:[%s1307_s13 + $0x20] ss:$8 sps:$4 sm:$0xff]   ;;  %v1189_v27 = vld [vmem:[%s1307_s13 + $0x34] ss:$8 sps:$4 sm:$0xff]  }
  0x14   : > { %v1204_v25 = vld [vmem:[%s1307_s13 + $0xa4] ss:$8 sps:$4 sm:$0xff]   ;;  %v1206_v28 = vld [vmem:[%s1307_s13 + $0xa0] ss:$8 sps:$4 sm:$0xff]   ;;  %v1210_v29 = vld [vmem:[%s1307_s13 + $0xb4] ss:$8 sps:$4 sm:$0xff]  }
  0x15   : > { %1033 = vmatpush3.bf16.msra.mxu0 %v1169_v5  ;;  %1150 = vmatpush3.bf16.msra.mxu1 %v1169_v5  ;;  %v1191_v30 = vld [vmem:[%s1307_s13 + $0x30] ss:$8 sps:$4 sm:$0xff]   ;;  %v1195_v31 = vld [vmem:[%s1307_s13 + $0x44] ss:$8 sps:$4 sm:$0xff]   ;;  %v1197_v34 = vld [vmem:[%s1307_s13 + $0x40] ss:$8 sps:$4 sm:$0xff]  }
  0x16   : > { %1034 = vmatprep.subr.bf16.mxu0 %v1170_v6  ;;  %1143 = vmatprep.subr.bf16.mxu1 %v1170_v6  ;;  %v1212_v32 = vld [vmem:[%s1307_s13 + $0xb0] ss:$8 sps:$4 sm:$0xff]   ;;  %v1216_v33 = vld [vmem:[%s1307_s13 + $0xc4] ss:$8 sps:$4 sm:$0xff]   ;;  %v1201_v35 = vld [vmem:[%s1307_s13 + $0x54] ss:$8 sps:$4 sm:$0xff]  }
  0x17   : > { %v1218_v36 = vld [vmem:[%s1307_s13 + $0xc0] ss:$8 sps:$4 sm:$0xff]   ;;  %v1219_v37 = vld [vmem:[%s1307_s13 + $0xd4] ss:$8 sps:$4 sm:$0xff]   ;;  %v1203_v38 = vld [vmem:[%s1307_s13 + $0x50] ss:$8 sps:$4 sm:$0xff]  }
  0x18   : > { %v1207_v39 = vld [vmem:[%s1307_s13 + $0x64] ss:$8 sps:$4 sm:$0xff]   ;;  %v1221_v40 = vld [vmem:[%s1307_s13 + $0xd0] ss:$8 sps:$4 sm:$0xff]   ;;  %v1209_v42 = vld [vmem:[%s1307_s13 + $0x60] ss:$8 sps:$4 sm:$0xff]  }
  0x19   : > { %1035 = vmatpush3.bf16.msra.mxu0 %v1171_v7  ;;  %1151 = vmatpush3.bf16.msra.mxu1 %v1171_v7  ;;  %v1222_v41 = vld [vmem:[%s1307_s13 + $0xe4] ss:$8 sps:$4 sm:$0xff]   ;;  %v1213_v43 = vld [vmem:[%s1307_s13 + $0x74] ss:$8 sps:$4 sm:$0xff]   ;;  %v1224_v44 = vld [vmem:[%s1307_s13 + $0xe0] ss:$8 sps:$4 sm:$0xff]  }
  0x1a   : > { %1036 = vmatprep.subr.bf16.mxu0 %v1172_v8  ;;  %1144 = vmatprep.subr.bf16.mxu1 %v1172_v8  ;;  %v1225_v45 = vld [vmem:[%s1307_s13 + $0xf4] ss:$8 sps:$4 sm:$0xff]   ;;  %v1215_v46 = vld [vmem:[%s1307_s13 + $0x70] ss:$8 sps:$4 sm:$0xff]  }
  0x1b   : > { %v1227_v47 = vld [vmem:[%s1307_s13 + $0xf0] ss:$8 sps:$4 sm:$0xff]   ;;  %s224_s13 = scalar_lea.vmem %s1506_s4, %s975_s19 }
  0x1d   : > { %1037 = vmatpush3.bf16.msra.mxu0 %v1173_v9  ;;  %1152 = vmatpush3.bf16.msra.mxu1 %v1173_v9 }
  0x1e   : > { %1038 = vmatprep.subr.bf16.mxu0 %v1174_v10  ;;  %1145 = vmatprep.subr.bf16.mxu1 %v1174_v10 }
  0x21   : > { %1039 = vmatpush3.bf16.msra.mxu0 %v1175_v12  ;;  %1153 = vmatpush3.bf16.msra.mxu1 %v1175_v12 }
  0x22   : > { %1040 = vmatprep.subr.bf16.mxu0 %v1176_v13  ;;  %1146 = vmatprep.subr.bf16.mxu1 %v1176_v13 }
  0x25   : > { %1041 = vmatpush3.bf16.msra.mxu0 %v1177_v15  ;;  %1154 = vmatpush3.bf16.msra.mxu1 %v1177_v15 }
  0x26   : > { %1042 = vmatprep.subr.bf16.mxu0 %v1178_v16  ;;  %1147 = vmatprep.subr.bf16.mxu1 %v1178_v16 }
  0x29   : > { %1043 = vmatpush3.bf16.msra.mxu0 %v1179_v17  ;;  %1155 = vmatpush3.bf16.msra.mxu1 %v1179_v17 }
  0x2c   : > { %579 = vmatmul.mubr.bf16.vlgmr.msra.gmra.mxu0 %v1180_v18  ;;  %643 = vmatmul.mubr.bf16.vlgmr.msra.gmra.mxu1 %v1192_v20 }
  0x2d   : > { %586 = vmatprep.mubr.bf16.mxu0 %v1183_v19  ;;  %650 = vmatprep.mubr.bf16.mxu1 %v1198_v21 }
  0x34   : > { %587 = vmatmul.mubr.bf16.gmra.mxu0 %v1185_v22  ;;  %651 = vmatmul.mubr.bf16.gmra.mxu1 %v1200_v24 }
  0x35   : > { %594 = vmatprep.mubr.bf16.mxu0 %v1186_v23  ;;  %658 = vmatprep.mubr.bf16.mxu1 %v1204_v25 }
  0x3c   : > { %595 = vmatmul.mubr.bf16.gmra.mxu0 %v1188_v26  ;;  %659 = vmatmul.mubr.bf16.gmra.mxu1 %v1206_v28 }
  0x3d   : > { %602 = vmatprep.mubr.bf16.mxu0 %v1189_v27  ;;  %666 = vmatprep.mubr.bf16.mxu1 %v1210_v29 }
  0x44   : > { %603 = vmatmul.mubr.bf16.gmra.mxu0 %v1191_v30  ;;  %667 = vmatmul.mubr.bf16.gmra.mxu1 %v1212_v32 }
  0x45   : > { %610 = vmatprep.mubr.bf16.mxu0 %v1195_v31  ;;  %674 = vmatprep.mubr.bf16.mxu1 %v1216_v33 }
  0x4c   : > { %611 = vmatmul.mubr.bf16.gmra.mxu0 %v1197_v34  ;;  %675 = vmatmul.mubr.bf16.gmra.mxu1 %v1218_v36 }
  0x4d   : > { %618 = vmatprep.mubr.bf16.mxu0 %v1201_v35  ;;  %682 = vmatprep.mubr.bf16.mxu1 %v1219_v37 }
  0x54   : > { %619 = vmatmul.mubr.bf16.gmra.mxu0 %v1203_v38  ;;  %683 = vmatmul.mubr.bf16.gmra.mxu1 %v1221_v40 }
  0x55   : > { %626 = vmatprep.mubr.bf16.mxu0 %v1207_v39  ;;  %690 = vmatprep.mubr.bf16.mxu1 %v1222_v41 }
  0x5c   : > { %627 = vmatmul.mubr.bf16.gmra.mxu0 %v1209_v42  ;;  %691 = vmatmul.mubr.bf16.gmra.mxu1 %v1224_v44 }
  0x5d   : > { %634 = vmatprep.mubr.bf16.mxu0 %v1213_v43  ;;  %698 = vmatprep.mubr.bf16.mxu1 %v1225_v45 }
  0x64   : > { %635 = vmatmul.mubr.bf16.gmra.mxu0 %v1215_v46  ;;  %699 = vmatmul.mubr.bf16.gmra.mxu1 %v1227_v47 }
  0xec   : > { %v1044_v48 = vpop.f32.mrf.mxu0  ;;  %v1092_v49 = vpop.f32.mrf.mxu1 }
  0xee   : > { %v1045_v50 = vpop.f32.mrf.mxu0  ;;  %v1093_v52 = vpop.f32.mrf.mxu1 }
  0xef   : > { %v1369_v51 = vadd.f32 %v1045_v50, %v1044_v48  ;;  %v1371_v54 = vadd.f32 %v1093_v52, %v1092_v49 }
  0xf0   : > { %v1047_v53 = vpop.f32.mrf.mxu0  ;;  %v1095_v55 = vpop.f32.mrf.mxu1 }
  0xf1   : > { %707 = vst [vmem:[%s1367_s7] sm:$0xff] %v1369_v51  ;;  %723 = vst [vmem:[%s1367_s7 + $0x80] sm:$0xff] %v1371_v54  ;;  %v776_v40 = vmul.f32 %v1369_v51, %v1369_v51 }
  0xf2   : > { %v1048_v56 = vpop.f32.mrf.mxu0  ;;  %v1096_v58 = vpop.f32.mrf.mxu1 }
  0xf3   : > { %v1049_v57 = vadd.f32 %v1048_v56, %v1047_v53  ;;  %v1377_v60 = vadd.f32 %v1096_v58, %v1095_v55 }
  0xf4   : > { %v1050_v59 = vpop.f32.mrf.mxu0  ;;  %v1098_v61 = vpop.f32.mrf.mxu1 }
  0xf5   : > { %708 = vst [vmem:[%s1367_s7 + $0x8] sm:$0xff] %v1049_v57  ;;  %724 = vst [vmem:[%s1367_s7 + $0x88] sm:$0xff] %v1377_v60  ;;  %v777_v35 = vmul.f32 %v1049_v57, %v1049_v57  ;;  %v739_v41 = vadd.f32 %v1049_v57, %v1369_v51 }
  0xf6   : > { %v1051_v62 = vpop.f32.mrf.mxu0  ;;  %v1099_v0 = vpop.f32.mrf.mxu1 }
  0xf7   : > { %v1052_v63 = vadd.f32 %v1051_v62, %v1050_v59  ;;  %v1382_v2 = vadd.f32 %v1099_v0, %v1098_v61  ;;  %v808_v45 = vadd.f32 %v777_v35, %v776_v40 }
  0xf8   : > { %v1053_v1 = vpop.f32.mrf.mxu0  ;;  %v1101_v3 = vpop.f32.mrf.mxu1 }
  0xf9   : > { %709 = vst [vmem:[%s1367_s7 + $0x10] sm:$0xff] %v1052_v63  ;;  %725 = vst [vmem:[%s1367_s7 + $0x90] sm:$0xff] %v1382_v2  ;;  %v778_v42 = vmul.f32 %v1052_v63, %v1052_v63  ;;  %v740_v46 = vadd.f32 %v1052_v63, %v739_v41 }
  0xfa   : > { %v1054_v4 = vpop.f32.mrf.mxu0  ;;  %v1102_v6 = vpop.f32.mrf.mxu1 }
  0xfb   : > { %v1055_v5 = vadd.f32 %v1054_v4, %v1053_v1  ;;  %v1387_v8 = vadd.f32 %v1102_v6, %v1101_v3  ;;  %v809_v53 = vadd.f32 %v808_v45, %v778_v42 }
  0xfc   : > { %v1056_v7 = vpop.f32.mrf.mxu0  ;;  %v1104_v9 = vpop.f32.mrf.mxu1 }
  0xfd   : > { %710 = vst [vmem:[%s1367_s7 + $0x18] sm:$0xff] %v1055_v5  ;;  %726 = vst [vmem:[%s1367_s7 + $0x98] sm:$0xff] %v1387_v8  ;;  %v779_v47 = vmul.f32 %v1055_v5, %v1055_v5  ;;  %v741_v55 = vadd.f32 %v1055_v5, %v740_v46 }
  0xfe   : > { %v1057_v10 = vpop.f32.mrf.mxu0  ;;  %v1105_v12 = vpop.f32.mrf.mxu1 }
  0xff   : > { %v1058_v11 = vadd.f32 %v1057_v10, %v1056_v7  ;;  %v1392_v14 = vadd.f32 %v1105_v12, %v1104_v9  ;;  %v810_v58 = vadd.f32 %v809_v53, %v779_v47 }
 0x100   : > { %v1059_v13 = vpop.f32.mrf.mxu0  ;;  %v1107_v15 = vpop.f32.mrf.mxu1 }
 0x101   : > { %711 = vst [vmem:[%s1367_s7 + $0x20] sm:$0xff] %v1058_v11  ;;  %727 = vst [vmem:[%s1367_s7 + $0xa0] sm:$0xff] %v1392_v14  ;;  %v780_v51 = vmul.f32 %v1058_v11, %v1058_v11  ;;  %v742_v59 = vadd.f32 %v1058_v11, %v741_v55 }
 0x102   : > { %v1060_v16 = vpop.f32.mrf.mxu0  ;;  %v1108_v18 = vpop.f32.mrf.mxu1 }
 0x103   : > { %v1061_v17 = vadd.f32 %v1060_v16, %v1059_v13  ;;  %v1397_v20 = vadd.f32 %v1108_v18, %v1107_v15  ;;  %v811_v3 = vadd.f32 %v810_v58, %v780_v51 }
 0x104   : > { %v1062_v19 = vpop.f32.mrf.mxu0  ;;  %v1110_v21 = vpop.f32.mrf.mxu1 }
 0x105   : > { %712 = vst [vmem:[%s1367_s7 + $0x28] sm:$0xff] %v1061_v17  ;;  %728 = vst [vmem:[%s1367_s7 + $0xa8] sm:$0xff] %v1397_v20  ;;  %v781_v61 = vmul.f32 %v1061_v17, %v1061_v17  ;;  %v743_v4 = vadd.f32 %v1061_v17, %v742_v59 }
 0x106   : > { %v1063_v22 = vpop.f32.mrf.mxu0  ;;  %v1111_v24 = vpop.f32.mrf.mxu1 }
 0x107   : > { %v1064_v23 = vadd.f32 %v1063_v22, %v1062_v19  ;;  %v1402_v26 = vadd.f32 %v1111_v24, %v1110_v21  ;;  %v812_v9 = vadd.f32 %v811_v3, %v781_v61 }
 0x108   : > { %v1065_v25 = vpop.f32.mrf.mxu0  ;;  %v1113_v27 = vpop.f32.mrf.mxu1 }
 0x109   : > { %713 = vst [vmem:[%s1367_s7 + $0x30] sm:$0xff] %v1064_v23  ;;  %729 = vst [vmem:[%s1367_s7 + $0xb0] sm:$0xff] %v1402_v26  ;;  %v782_v5 = vmul.f32 %v1064_v23, %v1064_v23  ;;  %v744_v10 = vadd.f32 %v1064_v23, %v743_v4 }
 0x10a   : > { %v1066_v28 = vpop.f32.mrf.mxu0  ;;  %v1114_v30 = vpop.f32.mrf.mxu1 }
 0x10b   : > { %v1067_v29 = vadd.f32 %v1066_v28, %v1065_v25  ;;  %v1407_v32 = vadd.f32 %v1114_v30, %v1113_v27  ;;  %v813_v18 = vadd.f32 %v812_v9, %v782_v5 }
 0x10c   : > { %v1068_v31 = vpop.f32.mrf.mxu0  ;;  %v1116_v33 = vpop.f32.mrf.mxu1 }
 0x10d   : > { %714 = vst [vmem:[%s1367_s7 + $0x38] sm:$0xff] %v1067_v29  ;;  %730 = vst [vmem:[%s1367_s7 + $0xb8] sm:$0xff] %v1407_v32  ;;  %v783_v12 = vmul.f32 %v1067_v29, %v1067_v29  ;;  %v745_v19 = vadd.f32 %v1067_v29, %v744_v10 }
 0x10e   : > { %v1069_v34 = vpop.f32.mrf.mxu0  ;;  %v1117_v37 = vpop.f32.mrf.mxu1 }
 0x10f   : > { %v1070_v36 = vadd.f32 %v1069_v34, %v1068_v31  ;;  %v1412_v39 = vadd.f32 %v1117_v37, %v1116_v33  ;;  %v814_v24 = vadd.f32 %v813_v18, %v783_v12  ;;  %v793_v18 = vmul.f32 %v1377_v60, %v1377_v60 }
 0x110   : > { %v1071_v38 = vpop.f32.mrf.mxu0  ;;  %v1119_v43 = vpop.f32.mrf.mxu1 }
 0x111   : > { %715 = vst [vmem:[%s1367_s7 + $0x40] sm:$0xff] %v1070_v36  ;;  %731 = vst [vmem:[%s1367_s7 + $0xc0] sm:$0xff] %v1412_v39  ;;  %v784_v17 = vmul.f32 %v1070_v36, %v1070_v36  ;;  %v746_v25 = vadd.f32 %v1070_v36, %v745_v19 }
 0x112   : > { %v1072_v44 = vpop.f32.mrf.mxu0  ;;  %v1120_v49 = vpop.f32.mrf.mxu1 }
 0x113   : > { %v1073_v48 = vadd.f32 %v1072_v44, %v1071_v38  ;;  %v1420_v52 = vadd.f32 %v1120_v49, %v1119_v43  ;;  %v815_v33 = vadd.f32 %v814_v24, %v784_v17 }
 0x114   : > { %v1074_v50 = vpop.f32.mrf.mxu0  ;;  %v1122_v56 = vpop.f32.mrf.mxu1 }
 0x115   : > { %716 = vst [vmem:[%s1367_s7 + $0x48] sm:$0xff] %v1073_v48  ;;  %732 = vst [vmem:[%s1367_s7 + $0xc8] sm:$0xff] %v1420_v52  ;;  %v785_v27 = vmul.f32 %v1073_v48, %v1073_v48  ;;  %v747_v34 = vadd.f32 %v1073_v48, %v746_v25  ;;  %v795_v25 = vmul.f32 %v1387_v8, %v1387_v8 }
 0x116   : > { %v1075_v57 = vpop.f32.mrf.mxu0  ;;  %v1123_v63 = vpop.f32.mrf.mxu1 }
 0x117   : > { %v1076_v62 = vadd.f32 %v1075_v57, %v1074_v50  ;;  %v1425_v1 = vadd.f32 %v1123_v63, %v1122_v56  ;;  %v816_v38 = vadd.f32 %v815_v33, %v785_v27 }
 0x118   : > { %v1077_v0 = vpop.f32.mrf.mxu0  ;;  %v1125_v6 = vpop.f32.mrf.mxu1 }
 0x119   : > { %717 = vst [vmem:[%s1367_s7 + $0x50] sm:$0xff] %v1076_v62  ;;  %733 = vst [vmem:[%s1367_s7 + $0xd0] sm:$0xff] %v1425_v1  ;;  %v786_v29 = vmul.f32 %v1076_v62, %v1076_v62  ;;  %v748_v40 = vadd.f32 %v1076_v62, %v747_v34 }
 0x11a   : > { %v1078_v7 = vpop.f32.mrf.mxu0  ;;  %v1126_v13 = vpop.f32.mrf.mxu1 }
 0x11b   : > { %v1079_v11 = vadd.f32 %v1078_v7, %v1077_v0  ;;  %v1430_v16 = vadd.f32 %v1126_v13, %v1125_v6  ;;  %v817_v45 = vadd.f32 %v816_v38, %v786_v29 }
 0x11c   : > { %v1080_v15 = vpop.f32.mrf.mxu0  ;;  %v1128_v21 = vpop.f32.mrf.mxu1 }
 0x11d   : > { %718 = vst [vmem:[%s1367_s7 + $0x58] sm:$0xff] %v1079_v11  ;;  %734 = vst [vmem:[%s1367_s7 + $0xd8] sm:$0xff] %v1430_v16  ;;  %v787_v41 = vmul.f32 %v1079_v11, %v1079_v11  ;;  %v749_v46 = vadd.f32 %v1079_v11, %v748_v40  ;;  %v792_v11 = vmul.f32 %v1371_v54, %v1371_v54 }
 0x11e   : > { %v1081_v22 = vpop.f32.mrf.mxu0  ;;  %v1129_v28 = vpop.f32.mrf.mxu1 }
 0x11f   : > { %v1082_v23 = vadd.f32 %v1081_v22, %v1080_v15  ;;  %v1435_v31 = vadd.f32 %v1129_v28, %v1128_v21  ;;  %v818_v50 = vadd.f32 %v817_v45, %v787_v41  ;;  %v794_v21 = vmul.f32 %v1382_v2, %v1382_v2 }
 0x120   : > { %v1083_v30 = vpop.f32.mrf.mxu0  ;;  %v1131_v35 = vpop.f32.mrf.mxu1 }
 0x121   : > { %719 = vst [vmem:[%s1367_s7 + $0x60] sm:$0xff] %v1082_v23  ;;  %735 = vst [vmem:[%s1367_s7 + $0xe0] sm:$0xff] %v1435_v31  ;;  %v788_v47 = vmul.f32 %v1082_v23, %v1082_v23  ;;  %v750_v53 = vadd.f32 %v1082_v23, %v749_v46 }
 0x122   : > { %v1084_v37 = vpop.f32.mrf.mxu0  ;;  %v1132_v42 = vpop.f32.mrf.mxu1 }
 0x123   : > { %v1085_v36 = vadd.f32 %v1084_v37, %v1083_v30  ;;  %v1440_v44 = vadd.f32 %v1132_v42, %v1131_v35  ;;  %v819_v59 = vadd.f32 %v818_v50, %v788_v47 }
 0x124   : > { %v1086_v43 = vpop.f32.mrf.mxu0  ;;  %v1134_v48 = vpop.f32.mrf.mxu1 }
 0x125   : > { %720 = vst [vmem:[%s1367_s7 + $0x68] sm:$0xff] %v1085_v36  ;;  %736 = vst [vmem:[%s1367_s7 + $0xe8] sm:$0xff] %v1440_v44  ;;  %v789_v55 = vmul.f32 %v1085_v36, %v1085_v36  ;;  %v751_v61 = vadd.f32 %v1085_v36, %v750_v53  ;;  %v801_v36 = vmul.f32 %v1420_v52, %v1420_v52 }
 0x126   : > { %v1087_v49 = vpop.f32.mrf.mxu0  ;;  %v1135_v56 = vpop.f32.mrf.mxu1  ;;  %v805_v53 = vmul.f32 %v1440_v44, %v1440_v44 }
 0x127   : > { %v1088_v51 = vadd.f32 %v1087_v49, %v1086_v43  ;;  %v1136_v58 = vadd.f32 %v1135_v56, %v1134_v48  ;;  %v820_v3 = vadd.f32 %v819_v59, %v789_v55 }
 0x128   : > { %v1089_v57 = vpop.f32.mrf.mxu0  ;;  %v1137_v63 = vpop.f32.mrf.mxu1 }
 0x129   : > { %721 = vst [vmem:[%s1367_s7 + $0x70] sm:$0xff] %v1088_v51  ;;  %v790_v62 = vmul.f32 %v1088_v51, %v1088_v51  ;;  %737 = vst [vmem:[%s1367_s7 + $0xf0] sm:$0xff] %v1136_v58  ;;  %v752_v4 = vadd.f32 %v1088_v51, %v751_v61  ;;  %v806_v51 = vmul.f32 %v1136_v58, %v1136_v58 }
 0x12a   : > { %v1090_v0 = vpop.f32.mrf.mxu0  ;;  %v1138_v6 = vpop.f32.mrf.mxu1 }
 0x12b   : > { %v1091_v5 = vadd.f32 %v1090_v0, %v1089_v57  ;;  %v1139_v7 = vadd.f32 %v1138_v6, %v1137_v63  ;;  %v821_v9 = vadd.f32 %v820_v3, %v790_v62 }
 0x12d   : > { %722 = vst [vmem:[%s1367_s7 + $0x78] sm:$0xff] %v1091_v5  ;;  %v753_v10 = vadd.f32 %v1091_v5, %v752_v4  ;;  %v791_v12 = vmul.f32 %v1091_v5, %v1091_v5  ;;  %738 = vst [vmem:[%s1367_s7 + $0xf8] sm:$0xff] %v1139_v7 }
 0x12f   : > { %v754_v13 = vadd.f32 %v1371_v54, %v753_v10  ;;  %v822_v15 = vadd.f32 %v821_v9, %v791_v12  ;;  %v796_v54 = vmul.f32 %v1392_v14, %v1392_v14 }
 0x131   : > { %v755_v19 = vadd.f32 %v1377_v60, %v754_v13  ;;  %v823_v17 = vadd.f32 %v822_v15, %v792_v11  ;;  %v797_v60 = vmul.f32 %v1397_v20, %v1397_v20 }
 0x133   : > { %v756_v22 = vadd.f32 %v1382_v2, %v755_v19  ;;  %v824_v24 = vadd.f32 %v823_v17, %v793_v18  ;;  %v798_v2 = vmul.f32 %v1402_v26, %v1402_v26 }
 0x135   : > { %v757_v27 = vadd.f32 %v1387_v8, %v756_v22  ;;  %v825_v23 = vadd.f32 %v824_v24, %v794_v21  ;;  %v799_v8 = vmul.f32 %v1407_v32, %v1407_v32 }
 0x137   : > { %v826_v28 = vadd.f32 %v825_v23, %v795_v25  ;;  %v758_v30 = vadd.f32 %v1392_v14, %v757_v27  ;;  %v800_v14 = vmul.f32 %v1412_v39, %v1412_v39 }
 0x139   : > { %v759_v33 = vadd.f32 %v1397_v20, %v758_v30  ;;  %v827_v34 = vadd.f32 %v826_v28, %v796_v54 }
 0x13b   : > { %v760_v29 = vadd.f32 %v1402_v26, %v759_v33  ;;  %v828_v35 = vadd.f32 %v827_v34, %v797_v60 }
 0x13d   : > { %v761_v37 = vadd.f32 %v1407_v32, %v760_v29  ;;  %v829_v38 = vadd.f32 %v828_v35, %v798_v2  ;;  %v802_v32 = vmul.f32 %v1425_v1, %v1425_v1 }
 0x13f   : > { %v762_v40 = vadd.f32 %v1412_v39, %v761_v37  ;;  %v830_v41 = vadd.f32 %v829_v38, %v799_v8  ;;  %v803_v39 = vmul.f32 %v1430_v16, %v1430_v16 }
 0x141   : > { %v763_v20 = vadd.f32 %v1420_v52, %v762_v40  ;;  %v831_v42 = vadd.f32 %v830_v41, %v800_v14  ;;  %v804_v52 = vmul.f32 %v1435_v31, %v1435_v31 }
 0x143   : > { %v832_v26 = vadd.f32 %v831_v42, %v801_v36  ;;  %v764_v43 = vadd.f32 %v1425_v1, %v763_v20 }
 0x145   : > { %v833_v45 = vadd.f32 %v832_v26, %v802_v32  ;;  %v765_v46 = vadd.f32 %v1430_v16, %v764_v43  ;;  %v807_v16 = vmul.f32 %v1139_v7, %v1139_v7 }
 0x147   : > { %v834_v47 = vadd.f32 %v833_v45, %v803_v39  ;;  %v766_v48 = vadd.f32 %v1435_v31, %v765_v46 }
 0x149   : > { %v835_v49 = vadd.f32 %v834_v47, %v804_v52  ;;  %v767_v50 = vadd.f32 %v1440_v44, %v766_v48 }
 0x14b   : > { %v836_v1 = vadd.f32 %v835_v49, %v805_v53  ;;  %v768_v55 = vadd.f32 %v1136_v58, %v767_v50 }
 0x14d   : > { %v837_v56 = vadd.f32 %v836_v1, %v806_v51  ;;  %v769_v57 = vadd.f32 %v1139_v7, %v768_v55 }
 0x14f   : > { %v770_v59 = vrot.slane %v769_v57, 4  ;;  %v838_v61 = vadd.f32 %v837_v56, %v807_v16 }
 0x151   : > { %v771_v62 = vadd.f32 %v770_v59, %v769_v57  ;;  %v839_v63 = vrot.slane %v838_v61, 4 }
 0x153   : > { %v772_v0 = vrot.slane %v771_v62, 2  ;;  %v840_v31 = vadd.f32 %v839_v63, %v838_v61 }
 0x155   : > { %v773_v3 = vadd.f32 %v772_v0, %v771_v62  ;;  %v841_v4 = vrot.slane %v840_v31, 2 }
 0x157   : > { %v774_v5 = vrot.slane %v773_v3, 1  ;;  %v842_v6 = vadd.f32 %v841_v4, %v840_v31 }
 0x159   : > { %v775_v44 = vadd.f32 %v774_v5, %v773_v3  ;;  %v843_v58 = vrot.slane %v842_v6, 1 }
 0x15b   : > { %v844_v7 = vadd.f32 %v843_v58, %v842_v6  ;;  %845 = vst [vmem:[%s220_s10] sm:$0xff] %v775_v44 }
 0x15d   : > { %846 = vst [vmem:[%s224_s13] sm:$0xff] %v844_v7 }
 0x15e PF: > { %s15_s15 = sadd.s32 1, %s1234_s15  }
 0x15f   : > { %p12_p5 = scmp.ge.s32.totalorder %s15_s15, 6  }
 0x161   :  { %14 = sbr.rel (!%p12_p5) target bundleno = 1 (0x1), region = 82 }

</bundles_post_ra>
